<compile_context>
chip_gen: v7x
topology: tpu7x:2x2x1
jax: 0.10.0
libtpu: 0.0.40
codegen_flags: <defaults>
</compile_context>

<pallas_src>
import math

import jax
import jax.numpy as jnp
from jax.experimental import pallas as pl
from jax.experimental.pallas import tpu as pltpu

_LANES = 128


def _round_up(x: int, m: int) -> int:
    return ((x + m - 1) // m) * m


def _make_mlp_kernel(num_layers: int, sigmoid_output: bool):
    """Kernel refs: (x, w0, b0, w1, b1, ..., w_{L-1}, b_{L-1}, out)."""

    def kernel(*refs):
        x_ref = refs[0]
        out_ref = refs[-1]
        h = x_ref[...]                       # no eager upcast; dot accumulates in f32
        for i in range(num_layers):
            w = refs[1 + 2 * i][...]         # (in_i, out_i), pre-transposed (+ lane-padded last layer)
            b = refs[2 + 2 * i][...]         # (1, out_i), already f32
            lhs = h if h.dtype == w.dtype else h.astype(w.dtype)
            h = jnp.dot(lhs, w, preferred_element_type=jnp.float32)
            h = h + b
            if i < num_layers - 1:
                h = jnp.maximum(h, 0.0)      # ReLU between layers only
        if sigmoid_output:
            h = jax.nn.sigmoid(h)
        out_ref[...] = h.astype(out_ref.dtype)

    return kernel


def prepare_mlp_params(weights, biases):
    """One-time layout prep (hoisted out of the per-call hot path).

    weights[i]: PyTorch Linear shape (out_i, in_i) -> (in_i, out_i)
    biases[i]:  (out_i,)                           -> (1, out_i), float32
    The final layer is zero-padded along its output axis to a multiple of the
    128-lane vreg width so the kernel's HBM store is lane-dense (no vst.msk).

    Returns (w_prep, b_prep, output_dim) where output_dim is the logical
    (unpadded) output width.
    """
    w_t = [jnp.transpose(w) for w in weights]
    b_2 = [b.reshape(1, -1).astype(jnp.float32) for b in biases]
    out_dim = w_t[-1].shape[1]
    out_pad = _round_up(out_dim, _LANES)
    if out_pad != out_dim:
        w_t[-1] = jnp.pad(w_t[-1], ((0, 0), (0, out_pad - out_dim)))
        b_2[-1] = jnp.pad(b_2[-1], ((0, 0), (0, out_pad - out_dim)))
    return w_t, b_2, out_dim


def mlp_pallas(x, prepared_weights, prepared_biases, output_dim,
               sigmoid_output: bool = False, tm_target: int = 512):
    """Runs the MLP forward pass in a single gridded Pallas TPU kernel.

    Args:
      x: (..., input_dim) array.
      prepared_weights / prepared_biases / output_dim: from prepare_mlp_params.
    Returns:
      (..., output_dim) array, same dtype as x.
    """
    num_layers = len(prepared_weights)
    lead_shape = x.shape[:-1]
    in_dim = x.shape[-1]
    out_pad = prepared_weights[-1].shape[1]          # lane-padded store width
    m = int(math.prod(lead_shape)) if lead_shape else 1
    x2 = x.reshape(m, in_dim)

    # Row tile: multiple of 8 always; 512 rows when M is large (friendly to
    # both the 128-tall v5e and 256-tall v6e/v7x systolic arrays).
    if m <= tm_target:
        tm = _round_up(m, 8)
    else:
        tm = tm_target
    m_pad = _round_up(m, tm)
    if m_pad != m:
        x2 = jnp.pad(x2, ((0, m_pad - m), (0, 0)))
    grid = (m_pad // tm,)

    # x tiled over rows; weights/biases pinned to block (0,0) -> VMEM-resident.
    args = [x2]
    in_specs = [pl.BlockSpec((tm, in_dim), lambda i: (i, 0))]
    for w, b in zip(prepared_weights, prepared_biases):
        args += [w, b]
        in_specs += [
            pl.BlockSpec(w.shape, lambda i: (0, 0)),
            pl.BlockSpec(b.shape, lambda i: (0, 0)),
        ]

    out_shape = jax.ShapeDtypeStruct((m_pad, out_pad), x.dtype)
    out_spec = pl.BlockSpec((tm, out_pad), lambda i: (i, 0))

    # Advisory cost estimate for XLA scheduling around the custom call.
    flops = 2 * m_pad * sum(w.shape[0] * w.shape[1] for w in prepared_weights)
    param_bytes = sum(int(w.size) * w.dtype.itemsize for w in prepared_weights) + \
                  sum(int(b.size) * b.dtype.itemsize for b in prepared_biases)
    bytes_accessed = (int(x2.size) * x2.dtype.itemsize
                      + param_bytes
                      + m_pad * out_pad * jnp.dtype(x.dtype).itemsize)
    cost = pl.CostEstimate(
        flops=int(flops),
        transcendentals=int(m_pad * out_pad) if sigmoid_output else 0,
        bytes_accessed=int(bytes_accessed),
    )

    # Explicit VMEM budget: double-buffered x/out tiles + resident params.
    # Capped at 48 MiB so it stays safely inside v7x's 64 MiB physical VMEM.
    itemsize = jnp.dtype(x.dtype).itemsize
    vmem_est = (2 * tm * in_dim * itemsize
                + 2 * tm * out_pad * itemsize
                + 2 * param_bytes)
    vmem_limit = int(min(48 << 20, max(16 << 20, 4 * vmem_est)))

    kernel = _make_mlp_kernel(num_layers, sigmoid_output)
    y2 = pl.pallas_call(
        kernel,
        out_shape=out_shape,
        grid=grid,
        in_specs=in_specs,
        out_specs=out_spec,
        cost_estimate=cost,
        compiler_params=pltpu.CompilerParams(
            dimension_semantics=("parallel",),   # shard row tiles across TCs (v7x)
            vmem_limit_bytes=vmem_limit,
        ),
    )(*args)

    # Drop row padding and lane padding (layout plumbing only, no compute).
    y2 = y2[:m, :output_dim]
    return y2.reshape(*lead_shape, output_dim)


def mlp_reference(x, weights, biases, sigmoid_output: bool = False):
    """Pure-JAX reference matching the PyTorch module semantics."""
    num_layers = len(weights)
    h = x.astype(jnp.float32)
    for i, (w, b) in enumerate(zip(weights, biases)):
        h = h @ jnp.transpose(w).astype(jnp.float32) + b.astype(jnp.float32)
        if i < num_layers - 1:
            h = jnp.maximum(h, 0.0)
    if sigmoid_output:
        h = jax.nn.sigmoid(h)
    return h.astype(x.dtype)


def init_mlp_params(key, input_dim, hidden_dim, output_dim, num_layers):
    """Deterministic PyTorch-style (uniform +/- 1/sqrt(fan_in)) Linear init."""
    h = [hidden_dim] * (num_layers - 1)
    dims_in = [input_dim] + h
    dims_out = h + [output_dim]
    weights, biases = [], []
    for n, k in zip(dims_in, dims_out):
        key, kw, kb = jax.random.split(key, 3)
        bound = 1.0 / math.sqrt(n)
        weights.append(jax.random.uniform(kw, (k, n), jnp.float32, -bound, bound))
        biases.append(jax.random.uniform(kb, (k,), jnp.float32, -bound, bound))
    return weights, biases


if __name__ == "__main__":
    key = jax.random.PRNGKey(0)

    input_dim, hidden_dim, output_dim, num_layers = 32, 64, 16, 3

    key, kp = jax.random.split(key)
    weights, biases = init_mlp_params(kp, input_dim, hidden_dim, output_dim, num_layers)
    w_prep, b_prep, out_dim = prepare_mlp_params(weights, biases)  # one-time prep

    # Case 1: small, single-tile (batch=2, seq=8), module-default sigmoid=False.
    key, kx = jax.random.split(key)
    x_small = jax.random.normal(kx, (2, 8, input_dim), jnp.float32)
    y_small = jax.block_until_ready(
        mlp_pallas(x_small, w_prep, b_prep, out_dim, sigmoid_output=False))
    y_small_ref = mlp_reference(x_small, weights, biases, sigmoid_output=False)
    assert y_small.shape == (2, 8, output_dim)
    assert jnp.allclose(y_small, y_small_ref, atol=1e-5, rtol=1e-5), \
        "Pallas MLP mismatch vs reference (small case)"

    # Case 2: larger M exercising the row grid + padding path, with sigmoid head.
    key, kx2 = jax.random.split(key)
    x_big = jax.random.normal(kx2, (4, 300, input_dim), jnp.float32)  # M=1200 -> grid>1
    y_big = jax.block_until_ready(
        mlp_pallas(x_big, w_prep, b_prep, out_dim, sigmoid_output=True))
    y_big_ref = mlp_reference(x_big, weights, biases, sigmoid_output=True)
    assert y_big.shape == (4, 300, output_dim)
    assert jnp.allclose(y_big, y_big_ref, atol=1e-5, rtol=1e-5), \
        "Pallas MLP mismatch vs reference (gridded case)"

    print("KERNEL_OK")
</pallas_src>

<mosaic_0001>
module attributes {stable_mosaic.version = 11 : i64} {
  func.func @kernel(%arg0: i32, %arg1: memref<16x32xf32, #tpu.memory_space<vmem>>, %arg2: memref<32x64xf32, #tpu.memory_space<vmem>>, %arg3: memref<1x64xf32, #tpu.memory_space<vmem>>, %arg4: memref<64x64xf32, #tpu.memory_space<vmem>>, %arg5: memref<1x64xf32, #tpu.memory_space<vmem>>, %arg6: memref<64x128xf32, #tpu.memory_space<vmem>>, %arg7: memref<1x128xf32, #tpu.memory_space<vmem>>, %arg8: memref<16x128xf32, #tpu.memory_space<vmem>>) attributes {dimension_semantics = [#tpu.dimension_semantics<parallel>], iteration_bounds = array<i64: 1>, scalar_prefetch = 0 : i64, scratch_operands = 0 : i64, tpu.core_type = #tpu.core_type<tc>, window_params = [{transform_indices = @transform_0, window_bounds = array<i64: 16, 32>}, {pipeline_mode = #tpu.pipeline_mode<synchronous>, transform_indices = @transform_1, window_bounds = array<i64: 32, 64>}, {pipeline_mode = #tpu.pipeline_mode<synchronous>, transform_indices = @transform_2, window_bounds = array<i64: 1, 64>}, {pipeline_mode = #tpu.pipeline_mode<synchronous>, transform_indices = @transform_3, window_bounds = array<i64: 64, 64>}, {pipeline_mode = #tpu.pipeline_mode<synchronous>, transform_indices = @transform_4, window_bounds = array<i64: 1, 64>}, {pipeline_mode = #tpu.pipeline_mode<synchronous>, transform_indices = @transform_5, window_bounds = array<i64: 64, 128>}, {pipeline_mode = #tpu.pipeline_mode<synchronous>, transform_indices = @transform_6, window_bounds = array<i64: 1, 128>}, {transform_indices = @transform_7, window_bounds = array<i64: 16, 128>}]} {
    %c0 = arith.constant 0 : index
    %c0_0 = arith.constant 0 : index
    %0 = vector.load %arg1[%c0, %c0_0] : memref<16x32xf32, #tpu.memory_space<vmem>>, vector<16x32xf32>
    %c0_1 = arith.constant 0 : index
    %c0_2 = arith.constant 0 : index
    %1 = vector.load %arg2[%c0_1, %c0_2] : memref<32x64xf32, #tpu.memory_space<vmem>>, vector<32x64xf32>
    %c0_3 = arith.constant 0 : index
    %c0_4 = arith.constant 0 : index
    %2 = vector.load %arg3[%c0_3, %c0_4] : memref<1x64xf32, #tpu.memory_space<vmem>>, vector<1x64xf32>
    %cst = arith.constant dense<0.000000e+00> : vector<16x64xf32>
    %3 = tpu.matmul %0, %1, %cst {dimension_numbers = #tpu.dot_dimension_numbers<[1], [0], [0], [1], [0, 0, 1, 1], [], []>} : vector<16x32xf32>, vector<32x64xf32>, vector<16x64xf32> -> vector<16x64xf32>
    %4 = vector.broadcast %2 : vector<1x64xf32> to vector<16x64xf32>
    %5 = arith.addf %3, %4 : vector<16x64xf32>
    %cst_5 = arith.constant 0.000000e+00 : f32
    %6 = vector.broadcast %cst_5 : f32 to vector<16x64xf32>
    %7 = arith.maximumf %5, %6 : vector<16x64xf32>
    %c0_6 = arith.constant 0 : index
    %c0_7 = arith.constant 0 : index
    %8 = vector.load %arg4[%c0_6, %c0_7] : memref<64x64xf32, #tpu.memory_space<vmem>>, vector<64x64xf32>
    %c0_8 = arith.constant 0 : index
    %c0_9 = arith.constant 0 : index
    %9 = vector.load %arg5[%c0_8, %c0_9] : memref<1x64xf32, #tpu.memory_space<vmem>>, vector<1x64xf32>
    %cst_10 = arith.constant dense<0.000000e+00> : vector<16x64xf32>
    %10 = tpu.matmul %7, %8, %cst_10 {dimension_numbers = #tpu.dot_dimension_numbers<[1], [0], [0], [1], [0, 0, 1, 1], [], []>} : vector<16x64xf32>, vector<64x64xf32>, vector<16x64xf32> -> vector<16x64xf32>
    %11 = vector.broadcast %9 : vector<1x64xf32> to vector<16x64xf32>
    %12 = arith.addf %10, %11 : vector<16x64xf32>
    %cst_11 = arith.constant 0.000000e+00 : f32
    %13 = vector.broadcast %cst_11 : f32 to vector<16x64xf32>
    %14 = arith.maximumf %12, %13 : vector<16x64xf32>
    %c0_12 = arith.constant 0 : index
    %c0_13 = arith.constant 0 : index
    %15 = vector.load %arg6[%c0_12, %c0_13] : memref<64x128xf32, #tpu.memory_space<vmem>>, vector<64x128xf32>
    %c0_14 = arith.constant 0 : index
    %c0_15 = arith.constant 0 : index
    %16 = vector.load %arg7[%c0_14, %c0_15] : memref<1x128xf32, #tpu.memory_space<vmem>>, vector<1x128xf32>
    %cst_16 = arith.constant dense<0.000000e+00> : vector<16x128xf32>
    %17 = tpu.matmul %14, %15, %cst_16 {dimension_numbers = #tpu.dot_dimension_numbers<[1], [0], [0], [1], [0, 0, 1, 1], [], []>} : vector<16x64xf32>, vector<64x128xf32>, vector<16x128xf32> -> vector<16x128xf32>
    %18 = vector.broadcast %16 : vector<1x128xf32> to vector<16x128xf32>
    %19 = arith.addf %17, %18 : vector<16x128xf32>
    %c0_17 = arith.constant 0 : index
    %c0_18 = arith.constant 0 : index
    %20 = vector.load %arg8[%c0_17, %c0_18] : memref<16x128xf32, #tpu.memory_space<vmem>>, vector<16x128xf32>
    tpu.vector_store %arg8[%c0_17, %c0_18], %19 {strides = array<i32>} : memref<16x128xf32, #tpu.memory_space<vmem>>, vector<16x128xf32>,
    return
  }
  func.func @transform_0(%arg0: i32) -> (i32, i32) {
    %c0_i32 = arith.constant 0 : i32
    %c0_i32_0 = arith.constant 0 : i32
    return %arg0, %c0_i32 : i32, i32
  }
  func.func @transform_1(%arg0: i32) -> (i32, i32) {
    %c0_i32 = arith.constant 0 : i32
    %c0_i32_0 = arith.constant 0 : i32
    %c0_i32_1 = arith.constant 0 : i32
    return %c0_i32, %c0_i32_0 : i32, i32
  }
  func.func @transform_2(%arg0: i32) -> (i32, i32) {
    %c0_i32 = arith.constant 0 : i32
    %c0_i32_0 = arith.constant 0 : i32
    %c0_i32_1 = arith.constant 0 : i32
    return %c0_i32, %c0_i32_0 : i32, i32
  }
  func.func @transform_3(%arg0: i32) -> (i32, i32) {
    %c0_i32 = arith.constant 0 : i32
    %c0_i32_0 = arith.constant 0 : i32
    %c0_i32_1 = arith.constant 0 : i32
    return %c0_i32, %c0_i32_0 : i32, i32
  }
  func.func @transform_4(%arg0: i32) -> (i32, i32) {
    %c0_i32 = arith.constant 0 : i32
    %c0_i32_0 = arith.constant 0 : i32
    %c0_i32_1 = arith.constant 0 : i32
    return %c0_i32, %c0_i32_0 : i32, i32
  }
  func.func @transform_5(%arg0: i32) -> (i32, i32) {
    %c0_i32 = arith.constant 0 : i32
    %c0_i32_0 = arith.constant 0 : i32
    %c0_i32_1 = arith.constant 0 : i32
    return %c0_i32, %c0_i32_0 : i32, i32
  }
  func.func @transform_6(%arg0: i32) -> (i32, i32) {
    %c0_i32 = arith.constant 0 : i32
    %c0_i32_0 = arith.constant 0 : i32
    %c0_i32_1 = arith.constant 0 : i32
    return %c0_i32, %c0_i32_0 : i32, i32
  }
  func.func @transform_7(%arg0: i32) -> (i32, i32) {
    %c0_i32 = arith.constant 0 : i32
    %c0_i32_0 = arith.constant 0 : i32
    return %arg0, %c0_i32 : i32, i32
  }
}

</mosaic_0001>

<bundles_post_ra>
// kernel: tpu_custom_call.1
= control target key start
LH: loop header
LB: loop body
LE: loop exit
PB: predicated region body
PF: predicated region fallthrough
CT: control target
= control target key end

     0   :  { %12 = vsyncpa [#allocation3], 0  ;;  %s795_s0 = inlined_call_operand.hbm [shape: f32[16,32], index: 0, kind: input, shape index: {}]   ;;  %s796_s1 = inlined_call_operand.hbm [shape: f32[32,64], index: 1, kind: input, shape index: {}]   ;;  %s797_s2 = inlined_call_operand.vmem [shape: f32[1,64], index: 2, kind: input, shape index: {}]   ;;  %s798_s3 = inlined_call_operand.hbm [shape: f32[64,64], index: 3, kind: input, shape index: {}]   ;;  %s799_s4 = inlined_call_operand.vmem [shape: f32[1,64], index: 4, kind: input, shape index: {}]   ;;  %s800_s5 = inlined_call_operand.hbm [shape: f32[64,128], index: 5, kind: input, shape index: {}]   ;;  %s801_s6 = inlined_call_operand.vmem [shape: f32[1,128], index: 6, kind: input, shape index: {}]   ;;  %s802_s7 = inlined_call_operand.hbm [shape: f32[16,128], index: 7, kind: output, shape index: {}]  }
   0x1   :  { %13 = vsyncpa [#allocation6], 0 }
   0x2   :  { %14 = vsyncpa [#allocation9], 0 }
   0x3   :  { %15 = vsyncpa [#allocation4], 0  ;;  %s644_s24 = smov [#allocation5]   ;;  %s645_s26 = smov [#allocation2]  }
   0x4   :  { %s33_s25 = sshll.u32 %s644_s24, 4  ;;  %s21_s27 = sshll.u32 %s645_s26, 4  ;;  %s34_s25 = int_to_ptr.vmem [resolvable:$true] %s33_s25  ;;  %s691_s27 = int_to_ptr.vmem [resolvable:$true] %s21_s27 }
   0x5   :  { %s526_s30 = scalar_lea.hbm %s796_s1, 512 }
   0x6   :  { %p527_p0 = scmp.ne.s32.totalorder %s796_s1, %s526_s30  ;;  %p530_p1 = scmp.lt.u32.totalorder %s526_s30, %s796_s1 }
   0x8   :  { %p532_p2 = pnand %p530_p1, %p527_p0 }
   0xa   :  { %535 = shalt.err (!%p532_p2)
}
   0xb   :  { %s536_s12 = scalar_lea.vmem %s34_s25, 512  ;;  %p541_p4 = scmp.lt.s32.totalorder %s34_s25, %s34_s25 }
   0xc   :  { %p537_p3 = scmp.ne.s32.totalorder %s34_s25, %s536_s12  ;;  %p542_p5 = scmp.lt.s32.totalorder %s536_s12, %s536_s12 }
   0xe   :  { %p543_p6 = por %p542_p5, %p541_p4 }
  0x10   :  { %p544_p7 = pnand %p543_p6, %p537_p3 }
  0x12   :  { %547 = shalt.err (!%p544_p7)
}
  0x13   :  { %s646_s13 = smov 128   ;;  %s647_s14 = smov 8  }
  0x14   :  { %39 = dma.hbm_to_vmem [thread:$0]  %s796_s1, 512, %s34_s25, [#allocation6], %s646_s13, %s646_s13, %s647_s14  }
  0x15   :  { %s548_s19 = scalar_lea.hbm %s795_s0, 256 }
  0x16   :  { %p549_p8 = scmp.ne.s32.totalorder %s795_s0, %s548_s19  ;;  %p552_p9 = scmp.lt.u32.totalorder %s548_s19, %s795_s0 }
  0x18   :  { %p554_p10 = pnand %p552_p9, %p549_p8 }
  0x1a   :  { %557 = shalt.err (!%p554_p10)
}
  0x1b   :  { %s558_s24 = scalar_lea.vmem %s691_s27, 256  ;;  %p563_p12 = scmp.lt.s32.totalorder %s691_s27, %s691_s27 }
  0x1c   :  { %p559_p11 = scmp.ne.s32.totalorder %s691_s27, %s558_s24  ;;  %p564_p13 = scmp.lt.s32.totalorder %s558_s24, %s558_s24 }
  0x1e   :  { %p565_p0 = por %p564_p13, %p563_p12 }
  0x20   :  { %p566_p1 = pnand %p565_p0, %p559_p11 }
  0x22   :  { %569 = shalt.err (!%p566_p1)
}
  0x23   :  { %27 = dma.hbm_to_vmem [thread:$0]  %s795_s0, 256, %s691_s27, [#allocation3], %s646_s13, %s646_s13, %s647_s14  }
  0x24   :  { %s648_s26 = smov [#allocation7]   ;;  %s649_s29 = smov [#allocation8]  }
  0x25   :  { %s47_s28 = sshll.u32 %s648_s26, 4  ;;  %s61_s30 = sshll.u32 %s649_s29, 4  ;;  %s48_s28 = int_to_ptr.vmem [resolvable:$true] %s47_s28  ;;  %s728_s30 = int_to_ptr.vmem [resolvable:$true] %s61_s30 }
  0x26   :  { %s570_s10 = scalar_lea.hbm %s798_s3, 1024 }
  0x27   :  { %p571_p2 = scmp.ne.s32.totalorder %s798_s3, %s570_s10  ;;  %p574_p3 = scmp.lt.u32.totalorder %s570_s10, %s798_s3 }
  0x29   :  { %p576_p4 = pnand %p574_p3, %p571_p2 }
  0x2b   :  { %579 = shalt.err (!%p576_p4)
}
  0x2c   :  { %s580_s0 = scalar_lea.vmem %s48_s28, 1024  ;;  %p585_p6 = scmp.lt.s32.totalorder %s48_s28, %s48_s28 }
  0x2d   :  { %p581_p5 = scmp.ne.s32.totalorder %s48_s28, %s580_s0  ;;  %p586_p7 = scmp.lt.s32.totalorder %s580_s0, %s580_s0 }
  0x2f   :  { %p587_p8 = por %p586_p7, %p585_p6 }
  0x31   :  { %p588_p9 = pnand %p587_p8, %p581_p5 }
  0x33   :  { %591 = shalt.err (!%p588_p9)
}
  0x34   :  { %53 = dma.hbm_to_vmem [thread:$0]  %s798_s3, 1024, %s48_s28, [#allocation6], %s646_s13, %s646_s13, %s647_s14  }
  0x35   :  { %s592_s20 = scalar_lea.hbm %s800_s5, 1024 }
  0x36   :  { %p593_p10 = scmp.ne.s32.totalorder %s800_s5, %s592_s20  ;;  %p596_p11 = scmp.lt.u32.totalorder %s592_s20, %s800_s5 }
  0x38   :  { %p598_p12 = pnand %p596_p11, %p593_p10 }
  0x3a   :  { %601 = shalt.err (!%p598_p12)
}
  0x3b   :  { %s602_s1 = scalar_lea.vmem %s728_s30, 1024  ;;  %p607_p0 = scmp.lt.s32.totalorder %s728_s30, %s728_s30 }
  0x3c   :  { %p603_p13 = scmp.ne.s32.totalorder %s728_s30, %s602_s1  ;;  %p608_p1 = scmp.lt.s32.totalorder %s602_s1, %s602_s1 }
  0x3e   :  { %p609_p2 = por %p608_p1, %p607_p0 }
  0x40   :  { %p610_p3 = pnand %p609_p2, %p603_p13 }
  0x42   :  { %613 = shalt.err (!%p610_p3)
}
  0x43   :  { %67 = dma.hbm_to_vmem [thread:$0]  %s800_s5, 1024, %s728_s30, [#allocation9], %s646_s13, %s646_s13, %s647_s14  }
  0x44   :  { %636 = dma.done.wait [#allocation3], 256  }
  0x45   :  { %637 = vsyncadd [#allocation3], 4294967040 }
  0x46   :  { %638 = dma.done.wait [#allocation6], 1536  }
  0x47   :  { %639 = vsyncadd [#allocation6], 4294965760 }
  0x48   :  { %640 = dma.done.wait [#allocation9], 1024  }
  0x49   :  { %641 = vsyncadd [#allocation9], 4294966272  ;;  %vm95_vm0 = vcmask 261120   ;;  %v84_v0 = vld [vmem:[#allocation5] sm:$0xff]  ;;  %v85_v1 = vld [vmem:[#allocation5 + $0x8] sm:$0xff]  ;;  %vm194_vm1 = vcmask 523264  }
  0x4a   :  { %v86_v2 = vld [vmem:[#allocation5 + $0x10] sm:$0xff]  ;;  %v479_v3 = vpack.c.bf16 %v85_v1, %v84_v0  ;;  %v87_v4 = vld [vmem:[#allocation5 + $0x18] sm:$0xff]  ;;  %v179_v7 = vld [vmem:[#allocation7] sm:$0xff]  ;;  %s650_s8 = smov [#allocation10]  }
  0x4b   :  { %v82_v5 = vld [vmem:[#allocation2] sm:$0xff]  ;;  %v483_v6 = vpack.c.bf16 %v87_v4, %v86_v2  ;;  %v180_v8 = vld [vmem:[#allocation7 + $0x8] sm:$0xff]  ;;  %v182_v11 = vld [vmem:[#allocation7 + $0x18] sm:$0xff]  ;;  %s381_s9 = sshll.u32 %s650_s8, 4  ;;  %s382_s9 = int_to_ptr.vmem [resolvable:$true] %s381_s9 }
  0x4c   :  { %438 = vmatprep.mubr.msk.f32.mxu0 %vm95_vm0, %v82_v5  ;;  %v181_v9 = vld [vmem:[#allocation7 + $0x10] sm:$0xff]  ;;  %480 = vmatprep.subr.bf16.mxu0 %v479_v3  ;;  %v487_v10 = vpack.c.bf16 %v180_v8, %v179_v7  ;;  %v183_v13 = vld [vmem:[#allocation7 + $0x20] sm:$0xff]  ;;  %v184_v14 = vld [vmem:[#allocation7 + $0x28] sm:$0xff]  ;;  %p619_p5 = scmp.lt.s32.totalorder %s382_s9, %s382_s9 }
  0x4d   :  { %482 = vmatpush3.bf16.msra.mxu0 %v479_v3  ;;  %v491_v12 = vpack.c.bf16 %v182_v11, %v181_v9  ;;  %v495_v15 = vpack.c.bf16 %v184_v14, %v183_v13  ;;  %v83_v16 = vld [vmem:[#allocation2 + $0x8] sm:$0xff]  ;;  %v185_v17 = vld [vmem:[#allocation7 + $0x30] sm:$0xff]  ;;  %v278_v20 = vld [vmem:[#allocation8] sm:$0xff] }
  0x4e   :  { %484 = vmatprep.subr.bf16.mxu0 %v483_v6  ;;  %488 = vmatprep.subr.bf16.mxu1 %v487_v10  ;;  %v186_v18 = vld [vmem:[#allocation7 + $0x38] sm:$0xff]  ;;  %v279_v21 = vld [vmem:[#allocation8 + $0x8] sm:$0xff]  ;;  %v280_v22 = vld [vmem:[#allocation8 + $0x10] sm:$0xff] }
  0x4f   :  { %490 = vmatpush3.bf16.msra.mxu1 %v487_v10  ;;  %v499_v19 = vpack.c.bf16 %v186_v18, %v185_v17  ;;  %v503_v23 = vpack.c.bf16 %v279_v21, %v278_v20  ;;  %v281_v24 = vld [vmem:[#allocation8 + $0x18] sm:$0xff]  ;;  %v282_v26 = vld [vmem:[#allocation8 + $0x20] sm:$0xff]  ;;  %v283_v27 = vld [vmem:[#allocation8 + $0x28] sm:$0xff] }
  0x50   :  { %492 = vmatprep.subr.bf16.mxu1 %v491_v12  ;;  %v507_v25 = vpack.c.bf16 %v281_v24, %v280_v22  ;;  %v511_v28 = vpack.c.bf16 %v283_v27, %v282_v26  ;;  %v395_v29 = vld [vmem:[%s797_s2] ss:$0 sm:$0xff]  ;;  %v285_v37 = vld [vmem:[#allocation8 + $0x38] sm:$0xff] }
  0x51   :  { %486 = vmatpush3.bf16.msra.mxu0 %v483_v6  ;;  %v284_v36 = vld [vmem:[#allocation8 + $0x30] sm:$0xff] }
  0x52   :  { %504 = vmatprep.subr.bf16.mxu0 %v503_v23  ;;  %v515_v38 = vpack.c.bf16 %v285_v37, %v284_v36  ;;  %v398_v39 = vld [vmem:[%s799_s4] ss:$0 sm:$0xff]  ;;  %s614_s4 = scalar_lea.vmem %s382_s9, 256 }
  0x53   :  { %494 = vmatpush3.bf16.msra.mxu1 %v491_v12  ;;  %v401_v46 = vld [vmem:[%s801_s6] ss:$0 sm:$0xff]  ;;  %p615_p4 = scmp.ne.s32.totalorder %s382_s9, %s614_s4  ;;  %p620_p6 = scmp.lt.s32.totalorder %s614_s4, %s614_s4 }
  0x54   :  { %439 = vmatmul.mubr.msk.f32.vlgmr.msra.gmra.mrb[0].mxu0 %vm95_vm0, %v83_v16  ;;  %496 = vmatprep.subr.bf16.mxu1 %v495_v15 }
  0x55   :  { %506 = vmatpush3.bf16.msra.mxu0 %v503_v23  ;;  %p621_p7 = por %p620_p6, %p619_p5 }
  0x56   :  { %508 = vmatprep.subr.bf16.mxu0 %v507_v25 }
  0x57   :  { %498 = vmatpush3.bf16.msra.mxu1 %v495_v15  ;;  %p622_p8 = pnand %p621_p7, %p615_p4 }
  0x58   :  { %500 = vmatprep.subr.bf16.mxu1 %v499_v19 }
  0x59   :  { %510 = vmatpush3.bf16.msra.mxu0 %v507_v25 }
  0x5a   :  { %512 = vmatprep.subr.bf16.mxu0 %v511_v28 }
  0x5b   :  { %502 = vmatpush3.bf16.msra.mxu1 %v499_v19 }
  0x5d   :  { %514 = vmatpush3.bf16.msra.mxu0 %v511_v28 }
  0x5e   :  { %516 = vmatprep.subr.bf16.mxu0 %v515_v38 }
  0x61   :  { %518 = vmatpush3.bf16.msra.mxu0 %v515_v38 }
 0x127   :  { %v440_v30 = vpop.f32.mrb[0].mxu0 }
 0x128   :  { %v174_v31 = vadd.f32 %v440_v30, %v395_v29  ;;  %v168_v32 = vpop.f32.mrb[1].mxu0 }
 0x129   :  { %v169_v33 = vadd.f32 %v395_v29, %v168_v32 }
 0x12a   :  { %v178_v35 = vmax.f32 %v174_v31, 0.0 }
 0x12b   :  { %v177_v34 = vmax.f32 %v169_v33, 0.0 }
 0x12d   :  { %457 = vmatprep.mubr.msk.f32.mxu1 %vm194_vm1, %v177_v34 }
 0x12e   :  { %458 = vmatmul.mubr.msk.f32.vlgmr.msra.gmra.mrb[0].mxu1 %vm194_vm1, %v178_v35 }
 0x201   :  { %v459_v40 = vpop.f32.mrb[0].mxu1 }
 0x202   :  { %v273_v41 = vadd.f32 %v459_v40, %v398_v39  ;;  %v267_v42 = vpop.f32.mrb[1].mxu1 }
 0x203   :  { %v268_v43 = vadd.f32 %v398_v39, %v267_v42 }
 0x204   :  { %v277_v45 = vmax.f32 %v273_v41, 0.0 }
 0x205   :  { %v276_v44 = vmax.f32 %v268_v43, 0.0 }
 0x207   :  { %476 = vmatprep.mubr.msk.f32.mxu0 %vm194_vm1, %v276_v44 }
 0x208   :  { %477 = vmatmul.mubr.msk.f32.vlgmr.msra.gmra.mrb[2].mxu0 %vm194_vm1, %v277_v45 }
 0x2db   :  { %v478_v47 = vpop.f32.mrb[2].mxu0 }
 0x2dc   :  { %v371_v48 = vadd.f32 %v478_v47, %v401_v46  ;;  %v365_v49 = vpop.f32.mrb[3].mxu0 }
 0x2dd   :  { %v366_v50 = vadd.f32 %v401_v46, %v365_v49 }
 0x2de   :  { %375 = vst [vmem:[#allocation10 + $0x8] sm:$0xff] %v371_v48 }
 0x2df   :  { %374 = vst [vmem:[#allocation10] sm:$0xff] %v366_v50 }
 0x2e0   :  { %625 = shalt.err (!%p622_p8)
}
 0x2e1   :  { %s626_s6 = scalar_lea.hbm %s802_s7, 256 }
 0x2e2   :  { %p627_p9 = scmp.ne.s32.totalorder %s802_s7, %s626_s6  ;;  %p630_p10 = scmp.lt.u32.totalorder %s626_s6, %s802_s7 }
 0x2e4   :  { %p632_p11 = pnand %p630_p10, %p627_p9 }
 0x2e6   :  { %635 = shalt.err (!%p632_p11)
}
 0x2e7   :  { %387 = dma.vmem_to_hbm [thread:$0]  %s382_s9, 256, %s802_s7, [#allocation4], %s646_s13, %s646_s13, %s647_s14  }
 0x2e8   :  { %642 = dma.done.wait [#allocation4], 256  }
 0x2e9   :  { %643 = vsyncadd [#allocation4], 4294967040 }
 0x2ea   :  { %391 = vsyncpa [#allocation3], 1 }
 0x2eb   :  { %392 = vsyncpa [#allocation6], 1 }
 0x2ec   :  { %393 = vsyncpa [#allocation9], 1 }
 0x2ed   :  { %394 = vsyncpa [#allocation4], 1 }

</bundles_post_ra>
